<compile_context>
chip_gen: v7x
topology: tpu7x:2x2x1
jax: 0.10.0
libtpu: 0.0.40
codegen_flags: <defaults>
</compile_context>

<pallas_src>
from functools import partial

import jax
import jax.numpy as jnp
from jax.experimental import pallas as pl
from jax.experimental.pallas import tpu as pltpu


def lstm_classifier_kernel(x_ref, wih_ref, whh_ref, b_ref, wfc_ref, bfc_ref,
                           y_ref, *, seq_len, batch, hidden):
    """x_ref:   (T*B, E)   bf16   (batch already padded to a sublane multiple)
       wih_ref: (E, 4H)    bf16   (W_ih^T)
       whh_ref: (H, 4H)    bf16   (W_hh^T)
       b_ref:   (1, 4H)    f32    (b_ih + b_hh)
       wfc_ref: (H, Lpad)  bf16   (W_fc^T, zero-padded to 128 lanes)
       bfc_ref: (1, Lpad)  f32
       y_ref:   (B, Lpad)  f32
    """
    T, B, H = seq_len, batch, hidden

    # --- hoisted off the recurrence critical path -------------------------
    # One MXU call projects ALL timesteps through W_ih, and the bias is
    # broadcast/added exactly once (JAX does not CSE broadcast_in_dim).
    xw_all = (jnp.dot(x_ref[...], wih_ref[...],
                      preferred_element_type=jnp.float32)
              + b_ref[...])                                  # (T*B, 4H) f32

    whh = whh_ref[...]                                       # (H, 4H) bf16, loaded once

    # h/c live in vregs for the whole recurrence (zeros == module.init_hidden()).
    h = jnp.zeros((B, H), jnp.float32)
    c = jnp.zeros((B, H), jnp.float32)

    # --- recurrence: static unroll, exactly one MXU issue per step --------
    for t in range(T):
        gates = (xw_all[t * B:(t + 1) * B, :]
                 + jnp.dot(h.astype(whh.dtype), whh,
                           preferred_element_type=jnp.float32))   # (B, 4H)
        # PyTorch gate order: i, f, g, o.  (Gate slices are 32-lane sub-vreg
        # views; the lane selects ride the XLU slot, off the VPU/EUP path.)
        i_g = jax.nn.sigmoid(gates[:, 0 * H:1 * H])
        f_g = jax.nn.sigmoid(gates[:, 1 * H:2 * H])
        g_g = jnp.tanh(gates[:, 2 * H:3 * H])
        o_g = jax.nn.sigmoid(gates[:, 3 * H:4 * H])
        c = f_g * c + i_g * g_g
        h = o_g * jnp.tanh(c)

    # FC on the last timestep's hidden state; output is lane-dense (Lpad=128)
    # so this is a single unmasked store.
    y_ref[...] = (jnp.dot(h.astype(wfc_ref.dtype), wfc_ref[...],
                          preferred_element_type=jnp.float32)
                  + bfc_ref[...])


def lstm_classifier_forward(sent, params, batch_size, hidden_dim):
    """sent: (T, B) int32 token ids.  Returns y: (B, label_size) float32."""
    emb_table = params["embedding"]           # (corpus_size, E)
    w_ih = params["w_ih"]                     # (4H, E)  PyTorch layout
    w_hh = params["w_hh"]                     # (4H, H)
    bias = (params["b_ih"] + params["b_hh"]).reshape(1, -1).astype(jnp.float32)
    w_fc = params["w_fc"]                     # (L, H)
    b_fc = params["b_fc"]                     # (L,)

    T, B = sent.shape
    assert B == batch_size
    E = emb_table.shape[1]
    H = hidden_dim
    L = w_fc.shape[0]

    # Hardware-friendly padding (stripped after the kernel):
    #   batch -> multiple of 8 (f32 sublane), FC output -> 128 lanes.
    B_pad = max(8, ((B + 7) // 8) * 8)
    L_pad = max(128, ((L + 127) // 128) * 128)

    # Embedding gather (plain-JAX glue); pad batch, flatten to (T*B_pad, E).
    # TODO(synk): fuse the gather into the kernel via PrefetchScalarGridSpec +
    # pl.Element when T*B*E is large enough to make the HBM round-trip matter.
    x = jnp.take(emb_table, sent, axis=0)                        # (T, B, E) f32
    x = jnp.pad(x, ((0, 0), (0, B_pad - B), (0, 0)))
    x_flat = x.reshape(T * B_pad, E).astype(jnp.bfloat16)

    # Pre-transpose / cast weights so the kernel feeds the MXU bf16 operands.
    wih_t = w_ih.T.astype(jnp.bfloat16)                          # (E, 4H)
    whh_t = w_hh.T.astype(jnp.bfloat16)                          # (H, 4H)
    wfc_t = jnp.pad(w_fc.T.astype(jnp.bfloat16),
                    ((0, 0), (0, L_pad - L)))                    # (H, L_pad)
    bfc = jnp.pad(b_fc.reshape(1, L).astype(jnp.float32),
                  ((0, 0), (0, L_pad - L)))                      # (1, L_pad)

    kernel = partial(lstm_classifier_kernel,
                     seq_len=T, batch=B_pad, hidden=H)

    y_pad = pl.pallas_call(
        kernel,
        out_shape=jax.ShapeDtypeStruct((B_pad, L_pad), jnp.float32),
        in_specs=[
            pl.BlockSpec(memory_space=pltpu.MemorySpace.VMEM),  # x_flat
            pl.BlockSpec(memory_space=pltpu.MemorySpace.VMEM),  # W_ih^T
            pl.BlockSpec(memory_space=pltpu.MemorySpace.VMEM),  # W_hh^T
            pl.BlockSpec(memory_space=pltpu.MemorySpace.VMEM),  # bias
            pl.BlockSpec(memory_space=pltpu.MemorySpace.VMEM),  # W_fc^T
            pl.BlockSpec(memory_space=pltpu.MemorySpace.VMEM),  # b_fc
        ],
        out_specs=pl.BlockSpec(memory_space=pltpu.MemorySpace.VMEM),
    )(x_flat, wih_t, whh_t, bias, wfc_t, bfc)

    return y_pad[:B, :L]


def _reference_forward(sent, params, hidden_dim, matmul_input_dtype=jnp.float32):
    """Pure-JAX reference with PyTorch nn.LSTM + nn.Linear semantics.
    With matmul_input_dtype=bf16 it mirrors the kernel's MXU-input
    quantization (bf16 operands, f32 accumulation, f32 elementwise)."""
    q = lambda a: a.astype(matmul_input_dtype).astype(jnp.float32)
    emb_table = params["embedding"]
    T, B = sent.shape
    H = hidden_dim
    x = q(jnp.take(emb_table, sent, axis=0))                     # (T, B, E)
    wih_t = q(params["w_ih"].T)
    whh_t = q(params["w_hh"].T)
    b = (params["b_ih"] + params["b_hh"]).astype(jnp.float32)
    wfc_t = q(params["w_fc"].T)
    b_fc = params["b_fc"].astype(jnp.float32)

    h = jnp.zeros((B, H), jnp.float32)
    c = jnp.zeros((B, H), jnp.float32)
    for t in range(T):
        gates = x[t] @ wih_t + q(h) @ whh_t + b
        i = jax.nn.sigmoid(gates[:, 0 * H:1 * H])
        f = jax.nn.sigmoid(gates[:, 1 * H:2 * H])
        g = jnp.tanh(gates[:, 2 * H:3 * H])
        o = jax.nn.sigmoid(gates[:, 3 * H:4 * H])
        c = f * c + i * g
        h = o * jnp.tanh(c)
    return q(h) @ wfc_t + b_fc


def init_params(key, corpus_size, embedding_dim, hidden_dim, label_size):
    ks = jax.random.split(key, 7)
    k = 1.0 / jnp.sqrt(hidden_dim)
    u = lambda kk, shape, s: jax.random.uniform(kk, shape, jnp.float32, -s, s)
    return {
        "embedding": jax.random.normal(ks[0], (corpus_size, embedding_dim), jnp.float32),
        "w_ih": u(ks[1], (4 * hidden_dim, embedding_dim), k),
        "w_hh": u(ks[2], (4 * hidden_dim, hidden_dim), k),
        "b_ih": u(ks[3], (4 * hidden_dim,), k),
        "b_hh": u(ks[4], (4 * hidden_dim,), k),
        "w_fc": u(ks[5], (label_size, hidden_dim), k),
        "b_fc": u(ks[6], (label_size,), k),
    }


if __name__ == "__main__":
    # Small, module-consistent shapes.
    SEQ_LEN = 8
    BATCH = 2
    EMB = 16
    HIDDEN = 32
    CORPUS = 50
    LABELS = 4

    key = jax.random.PRNGKey(0)
    pkey, skey = jax.random.split(key)
    params = init_params(pkey, CORPUS, EMB, HIDDEN, LABELS)

    sent = jax.random.randint(skey, (SEQ_LEN, BATCH), 0, CORPUS, dtype=jnp.int32)

    y = lstm_classifier_forward(sent, params, batch_size=BATCH, hidden_dim=HIDDEN)
    y = jax.block_until_ready(y)
    assert y.shape == (BATCH, LABELS)

    # Exact-numerics check (same bf16 MXU-input quantization as the kernel).
    y_ref_bf16 = _reference_forward(sent, params, HIDDEN, jnp.bfloat16)
    assert jnp.allclose(y, y_ref_bf16, atol=2e-3, rtol=2e-3), \
        "mismatch vs bf16-input JAX reference"

    # Fidelity check vs. pure-f32 PyTorch semantics (bf16 quantization noise only).
    y_ref_f32 = _reference_forward(sent, params, HIDDEN, jnp.float32)
    assert jnp.allclose(y, y_ref_f32, atol=5e-2, rtol=5e-2), \
        "mismatch vs f32 JAX reference"

    print("KERNEL_OK")
</pallas_src>

<mosaic_0001>
module attributes {stable_mosaic.version = 11 : i64} {
  func.func @lstm_classifier_kernel(%arg0: memref<64x16xbf16, #tpu.memory_space<vmem>>, %arg1: memref<16x128xbf16, #tpu.memory_space<vmem>>, %arg2: memref<32x128xbf16, #tpu.memory_space<vmem>>, %arg3: memref<1x128xf32, #tpu.memory_space<vmem>>, %arg4: memref<32x128xbf16, #tpu.memory_space<vmem>>, %arg5: memref<1x128xf32, #tpu.memory_space<vmem>>, %arg6: memref<8x128xf32, #tpu.memory_space<vmem>>) attributes {dimension_semantics = [], scalar_prefetch = 0 : i64, scratch_operands = 0 : i64, tpu.core_type = #tpu.core_type<tc>} {
    %c0 = arith.constant 0 : index
    %c0_0 = arith.constant 0 : index
    %0 = vector.load %arg0[%c0, %c0_0] : memref<64x16xbf16, #tpu.memory_space<vmem>>, vector<64x16xbf16>
    %c0_1 = arith.constant 0 : index
    %c0_2 = arith.constant 0 : index
    %1 = vector.load %arg1[%c0_1, %c0_2] : memref<16x128xbf16, #tpu.memory_space<vmem>>, vector<16x128xbf16>
    %cst = arith.constant dense<0.000000e+00> : vector<64x128xf32>
    %2 = tpu.matmul %0, %1, %cst {dimension_numbers = #tpu.dot_dimension_numbers<[1], [0], [0], [1], [0, 0, 1, 1], [], []>} : vector<64x16xbf16>, vector<16x128xbf16>, vector<64x128xf32> -> vector<64x128xf32>
    %c0_3 = arith.constant 0 : index
    %c0_4 = arith.constant 0 : index
    %3 = vector.load %arg3[%c0_3, %c0_4] : memref<1x128xf32, #tpu.memory_space<vmem>>, vector<1x128xf32>
    %4 = vector.broadcast %3 : vector<1x128xf32> to vector<64x128xf32>
    %5 = arith.addf %2, %4 : vector<64x128xf32>
    %c0_5 = arith.constant 0 : index
    %c0_6 = arith.constant 0 : index
    %6 = vector.load %arg2[%c0_5, %c0_6] : memref<32x128xbf16, #tpu.memory_space<vmem>>, vector<32x128xbf16>
    %cst_7 = arith.constant 0.000000e+00 : f32
    %7 = vector.broadcast %cst_7 : f32 to vector<8x32xf32>
    %cst_8 = arith.constant 0.000000e+00 : f32
    %8 = vector.broadcast %cst_8 : f32 to vector<8x32xf32>
    %9 = vector.extract_strided_slice %5 {offsets = [0, 0], sizes = [8, 128], strides = [1, 1]} : vector<64x128xf32> to vector<8x128xf32>
    %10 = arith.truncf %7 : vector<8x32xf32> to vector<8x32xbf16>
    %cst_9 = arith.constant dense<0.000000e+00> : vector<8x128xf32>
    %11 = tpu.matmul %10, %6, %cst_9 {dimension_numbers = #tpu.dot_dimension_numbers<[1], [0], [0], [1], [0, 0, 1, 1], [], []>} : vector<8x32xbf16>, vector<32x128xbf16>, vector<8x128xf32> -> vector<8x128xf32>
    %12 = arith.addf %9, %11 : vector<8x128xf32>
    %13 = vector.extract_strided_slice %12 {offsets = [0, 0], sizes = [8, 32], strides = [1, 1]} : vector<8x128xf32> to vector<8x32xf32>
    %14 = arith.negf %13 : vector<8x32xf32>
    %15 = math.exp %14 : vector<8x32xf32>
    %cst_10 = arith.constant 1.000000e+00 : f32
    %16 = vector.broadcast %cst_10 : f32 to vector<8x32xf32>
    %17 = arith.addf %16, %15 : vector<8x32xf32>
    %18 = arith.divf %16, %17 : vector<8x32xf32>
    %19 = vector.extract_strided_slice %12 {offsets = [0, 32], sizes = [8, 32], strides = [1, 1]} : vector<8x128xf32> to vector<8x32xf32>
    %20 = arith.negf %19 : vector<8x32xf32>
    %21 = math.exp %20 : vector<8x32xf32>
    %cst_11 = arith.constant 1.000000e+00 : f32
    %22 = vector.broadcast %cst_11 : f32 to vector<8x32xf32>
    %23 = arith.addf %22, %21 : vector<8x32xf32>
    %24 = arith.divf %22, %23 : vector<8x32xf32>
    %25 = vector.extract_strided_slice %12 {offsets = [0, 64], sizes = [8, 32], strides = [1, 1]} : vector<8x128xf32> to vector<8x32xf32>
    %26 = math.tanh %25 : vector<8x32xf32>
    %27 = vector.extract_strided_slice %12 {offsets = [0, 96], sizes = [8, 32], strides = [1, 1]} : vector<8x128xf32> to vector<8x32xf32>
    %28 = arith.negf %27 : vector<8x32xf32>
    %29 = math.exp %28 : vector<8x32xf32>
    %cst_12 = arith.constant 1.000000e+00 : f32
    %30 = vector.broadcast %cst_12 : f32 to vector<8x32xf32>
    %31 = arith.addf %30, %29 : vector<8x32xf32>
    %32 = arith.divf %30, %31 : vector<8x32xf32>
    %33 = arith.mulf %24, %8 : vector<8x32xf32>
    %34 = arith.mulf %18, %26 : vector<8x32xf32>
    %35 = arith.addf %33, %34 : vector<8x32xf32>
    %36 = math.tanh %35 : vector<8x32xf32>
    %37 = arith.mulf %32, %36 : vector<8x32xf32>
    %38 = vector.extract_strided_slice %5 {offsets = [8, 0], sizes = [8, 128], strides = [1, 1]} : vector<64x128xf32> to vector<8x128xf32>
    %39 = arith.truncf %37 : vector<8x32xf32> to vector<8x32xbf16>
    %cst_13 = arith.constant dense<0.000000e+00> : vector<8x128xf32>
    %40 = tpu.matmul %39, %6, %cst_13 {dimension_numbers = #tpu.dot_dimension_numbers<[1], [0], [0], [1], [0, 0, 1, 1], [], []>} : vector<8x32xbf16>, vector<32x128xbf16>, vector<8x128xf32> -> vector<8x128xf32>
    %41 = arith.addf %38, %40 : vector<8x128xf32>
    %42 = vector.extract_strided_slice %41 {offsets = [0, 0], sizes = [8, 32], strides = [1, 1]} : vector<8x128xf32> to vector<8x32xf32>
    %43 = arith.negf %42 : vector<8x32xf32>
    %44 = math.exp %43 : vector<8x32xf32>
    %cst_14 = arith.constant 1.000000e+00 : f32
    %45 = vector.broadcast %cst_14 : f32 to vector<8x32xf32>
    %46 = arith.addf %45, %44 : vector<8x32xf32>
    %47 = arith.divf %45, %46 : vector<8x32xf32>
    %48 = vector.extract_strided_slice %41 {offsets = [0, 32], sizes = [8, 32], strides = [1, 1]} : vector<8x128xf32> to vector<8x32xf32>
    %49 = arith.negf %48 : vector<8x32xf32>
    %50 = math.exp %49 : vector<8x32xf32>
    %cst_15 = arith.constant 1.000000e+00 : f32
    %51 = vector.broadcast %cst_15 : f32 to vector<8x32xf32>
    %52 = arith.addf %51, %50 : vector<8x32xf32>
    %53 = arith.divf %51, %52 : vector<8x32xf32>
    %54 = vector.extract_strided_slice %41 {offsets = [0, 64], sizes = [8, 32], strides = [1, 1]} : vector<8x128xf32> to vector<8x32xf32>
    %55 = math.tanh %54 : vector<8x32xf32>
    %56 = vector.extract_strided_slice %41 {offsets = [0, 96], sizes = [8, 32], strides = [1, 1]} : vector<8x128xf32> to vector<8x32xf32>
    %57 = arith.negf %56 : vector<8x32xf32>
    %58 = math.exp %57 : vector<8x32xf32>
    %cst_16 = arith.constant 1.000000e+00 : f32
    %59 = vector.broadcast %cst_16 : f32 to vector<8x32xf32>
    %60 = arith.addf %59, %58 : vector<8x32xf32>
    %61 = arith.divf %59, %60 : vector<8x32xf32>
    %62 = arith.mulf %53, %35 : vector<8x32xf32>
    %63 = arith.mulf %47, %55 : vector<8x32xf32>
    %64 = arith.addf %62, %63 : vector<8x32xf32>
    %65 = math.tanh %64 : vector<8x32xf32>
    %66 = arith.mulf %61, %65 : vector<8x32xf32>
    %67 = vector.extract_strided_slice %5 {offsets = [16, 0], sizes = [8, 128], strides = [1, 1]} : vector<64x128xf32> to vector<8x128xf32>
    %68 = arith.truncf %66 : vector<8x32xf32> to vector<8x32xbf16>
    %cst_17 = arith.constant dense<0.000000e+00> : vector<8x128xf32>
    %69 = tpu.matmul %68, %6, %cst_17 {dimension_numbers = #tpu.dot_dimension_numbers<[1], [0], [0], [1], [0, 0, 1, 1], [], []>} : vector<8x32xbf16>, vector<32x128xbf16>, vector<8x128xf32> -> vector<8x128xf32>
    %70 = arith.addf %67, %69 : vector<8x128xf32>
    %71 = vector.extract_strided_slice %70 {offsets = [0, 0], sizes = [8, 32], strides = [1, 1]} : vector<8x128xf32> to vector<8x32xf32>
    %72 = arith.negf %71 : vector<8x32xf32>
    %73 = math.exp %72 : vector<8x32xf32>
    %cst_18 = arith.constant 1.000000e+00 : f32
    %74 = vector.broadcast %cst_18 : f32 to vector<8x32xf32>
    %75 = arith.addf %74, %73 : vector<8x32xf32>
    %76 = arith.divf %74, %75 : vector<8x32xf32>
    %77 = vector.extract_strided_slice %70 {offsets = [0, 32], sizes = [8, 32], strides = [1, 1]} : vector<8x128xf32> to vector<8x32xf32>
    %78 = arith.negf %77 : vector<8x32xf32>
    %79 = math.exp %78 : vector<8x32xf32>
    %cst_19 = arith.constant 1.000000e+00 : f32
    %80 = vector.broadcast %cst_19 : f32 to vector<8x32xf32>
    %81 = arith.addf %80, %79 : vector<8x32xf32>
    %82 = arith.divf %80, %81 : vector<8x32xf32>
    %83 = vector.extract_strided_slice %70 {offsets = [0, 64], sizes = [8, 32], strides = [1, 1]} : vector<8x128xf32> to vector<8x32xf32>
    %84 = math.tanh %83 : vector<8x32xf32>
    %85 = vector.extract_strided_slice %70 {offsets = [0, 96], sizes = [8, 32], strides = [1, 1]} : vector<8x128xf32> to vector<8x32xf32>
    %86 = arith.negf %85 : vector<8x32xf32>
    %87 = math.exp %86 : vector<8x32xf32>
    %cst_20 = arith.constant 1.000000e+00 : f32
    %88 = vector.broadcast %cst_20 : f32 to vector<8x32xf32>
    %89 = arith.addf %88, %87 : vector<8x32xf32>
    %90 = arith.divf %88, %89 : vector<8x32xf32>
    %91 = arith.mulf %82, %64 : vector<8x32xf32>
    %92 = arith.mulf %76, %84 : vector<8x32xf32>
    %93 = arith.addf %91, %92 : vector<8x32xf32>
    %94 = math.tanh %93 : vector<8x32xf32>
    %95 = arith.mulf %90, %94 : vector<8x32xf32>
    %96 = vector.extract_strided_slice %5 {offsets = [24, 0], sizes = [8, 128], strides = [1, 1]} : vector<64x128xf32> to vector<8x128xf32>
    %97 = arith.truncf %95 : vector<8x32xf32> to vector<8x32xbf16>
    %cst_21 = arith.constant dense<0.000000e+00> : vector<8x128xf32>
    %98 = tpu.matmul %97, %6, %cst_21 {dimension_numbers = #tpu.dot_dimension_numbers<[1], [0], [0], [1], [0, 0, 1, 1], [], []>} : vector<8x32xbf16>, vector<32x128xbf16>, vector<8x128xf32> -> vector<8x128xf32>
    %99 = arith.addf %96, %98 : vector<8x128xf32>
    %100 = vector.extract_strided_slice %99 {offsets = [0, 0], sizes = [8, 32], strides = [1, 1]} : vector<8x128xf32> to vector<8x32xf32>
    %101 = arith.negf %100 : vector<8x32xf32>
    %102 = math.exp %101 : vector<8x32xf32>
    %cst_22 = arith.constant 1.000000e+00 : f32
    %103 = vector.broadcast %cst_22 : f32 to vector<8x32xf32>
    %104 = arith.addf %103, %102 : vector<8x32xf32>
    %105 = arith.divf %103, %104 : vector<8x32xf32>
    %106 = vector.extract_strided_slice %99 {offsets = [0, 32], sizes = [8, 32], strides = [1, 1]} : vector<8x128xf32> to vector<8x32xf32>
    %107 = arith.negf %106 : vector<8x32xf32>
    %108 = math.exp %107 : vector<8x32xf32>
    %cst_23 = arith.constant 1.000000e+00 : f32
    %109 = vector.broadcast %cst_23 : f32 to vector<8x32xf32>
    %110 = arith.addf %109, %108 : vector<8x32xf32>
    %111 = arith.divf %109, %110 : vector<8x32xf32>
    %112 = vector.extract_strided_slice %99 {offsets = [0, 64], sizes = [8, 32], strides = [1, 1]} : vector<8x128xf32> to vector<8x32xf32>
    %113 = math.tanh %112 : vector<8x32xf32>
    %114 = vector.extract_strided_slice %99 {offsets = [0, 96], sizes = [8, 32], strides = [1, 1]} : vector<8x128xf32> to vector<8x32xf32>
    %115 = arith.negf %114 : vector<8x32xf32>
    %116 = math.exp %115 : vector<8x32xf32>
    %cst_24 = arith.constant 1.000000e+00 : f32
    %117 = vector.broadcast %cst_24 : f32 to vector<8x32xf32>
    %118 = arith.addf %117, %116 : vector<8x32xf32>
    %119 = arith.divf %117, %118 : vector<8x32xf32>
    %120 = arith.mulf %111, %93 : vector<8x32xf32>
    %121 = arith.mulf %105, %113 : vector<8x32xf32>
    %122 = arith.addf %120, %121 : vector<8x32xf32>
    %123 = math.tanh %122 : vector<8x32xf32>
    %124 = arith.mulf %119, %123 : vector<8x32xf32>
    %125 = vector.extract_strided_slice %5 {offsets = [32, 0], sizes = [8, 128], strides = [1, 1]} : vector<64x128xf32> to vector<8x128xf32>
    %126 = arith.truncf %124 : vector<8x32xf32> to vector<8x32xbf16>
    %cst_25 = arith.constant dense<0.000000e+00> : vector<8x128xf32>
    %127 = tpu.matmul %126, %6, %cst_25 {dimension_numbers = #tpu.dot_dimension_numbers<[1], [0], [0], [1], [0, 0, 1, 1], [], []>} : vector<8x32xbf16>, vector<32x128xbf16>, vector<8x128xf32> -> vector<8x128xf32>
    %128 = arith.addf %125, %127 : vector<8x128xf32>
    %129 = vector.extract_strided_slice %128 {offsets = [0, 0], sizes = [8, 32], strides = [1, 1]} : vector<8x128xf32> to vector<8x32xf32>
    %130 = arith.negf %129 : vector<8x32xf32>
    %131 = math.exp %130 : vector<8x32xf32>
    %cst_26 = arith.constant 1.000000e+00 : f32
    %132 = vector.broadcast %cst_26 : f32 to vector<8x32xf32>
    %133 = arith.addf %132, %131 : vector<8x32xf32>
    %134 = arith.divf %132, %133 : vector<8x32xf32>
    %135 = vector.extract_strided_slice %128 {offsets = [0, 32], sizes = [8, 32], strides = [1, 1]} : vector<8x128xf32> to vector<8x32xf32>
    %136 = arith.negf %135 : vector<8x32xf32>
    %137 = math.exp %136 : vector<8x32xf32>
    %cst_27 = arith.constant 1.000000e+00 : f32
    %138 = vector.broadcast %cst_27 : f32 to vector<8x32xf32>
    %139 = arith.addf %138, %137 : vector<8x32xf32>
    %140 = arith.divf %138, %139 : vector<8x32xf32>
    %141 = vector.extract_strided_slice %128 {offsets = [0, 64], sizes = [8, 32], strides = [1, 1]} : vector<8x128xf32> to vector<8x32xf32>
    %142 = math.tanh %141 : vector<8x32xf32>
    %143 = vector.extract_strided_slice %128 {offsets = [0, 96], sizes = [8, 32], strides = [1, 1]} : vector<8x128xf32> to vector<8x32xf32>
    %144 = arith.negf %143 : vector<8x32xf32>
    %145 = math.exp %144 : vector<8x32xf32>
    %cst_28 = arith.constant 1.000000e+00 : f32
    %146 = vector.broadcast %cst_28 : f32 to vector<8x32xf32>
    %147 = arith.addf %146, %145 : vector<8x32xf32>
    %148 = arith.divf %146, %147 : vector<8x32xf32>
    %149 = arith.mulf %140, %122 : vector<8x32xf32>
    %150 = arith.mulf %134, %142 : vector<8x32xf32>
    %151 = arith.addf %149, %150 : vector<8x32xf32>
    %152 = math.tanh %151 : vector<8x32xf32>
    %153 = arith.mulf %148, %152 : vector<8x32xf32>
    %154 = vector.extract_strided_slice %5 {offsets = [40, 0], sizes = [8, 128], strides = [1, 1]} : vector<64x128xf32> to vector<8x128xf32>
    %155 = arith.truncf %153 : vector<8x32xf32> to vector<8x32xbf16>
    %cst_29 = arith.constant dense<0.000000e+00> : vector<8x128xf32>
    %156 = tpu.matmul %155, %6, %cst_29 {dimension_numbers = #tpu.dot_dimension_numbers<[1], [0], [0], [1], [0, 0, 1, 1], [], []>} : vector<8x32xbf16>, vector<32x128xbf16>, vector<8x128xf32> -> vector<8x128xf32>
    %157 = arith.addf %154, %156 : vector<8x128xf32>
    %158 = vector.extract_strided_slice %157 {offsets = [0, 0], sizes = [8, 32], strides = [1, 1]} : vector<8x128xf32> to vector<8x32xf32>
    %159 = arith.negf %158 : vector<8x32xf32>
    %160 = math.exp %159 : vector<8x32xf32>
    %cst_30 = arith.constant 1.000000e+00 : f32
    %161 = vector.broadcast %cst_30 : f32 to vector<8x32xf32>
    %162 = arith.addf %161, %160 : vector<8x32xf32>
    %163 = arith.divf %161, %162 : vector<8x32xf32>
    %164 = vector.extract_strided_slice %157 {offsets = [0, 32], sizes = [8, 32], strides = [1, 1]} : vector<8x128xf32> to vector<8x32xf32>
    %165 = arith.negf %164 : vector<8x32xf32>
    %166 = math.exp %165 : vector<8x32xf32>
    %cst_31 = arith.constant 1.000000e+00 : f32
    %167 = vector.broadcast %cst_31 : f32 to vector<8x32xf32>
    %168 = arith.addf %167, %166 : vector<8x32xf32>
    %169 = arith.divf %167, %168 : vector<8x32xf32>
    %170 = vector.extract_strided_slice %157 {offsets = [0, 64], sizes = [8, 32], strides = [1, 1]} : vector<8x128xf32> to vector<8x32xf32>
    %171 = math.tanh %170 : vector<8x32xf32>
    %172 = vector.extract_strided_slice %157 {offsets = [0, 96], sizes = [8, 32], strides = [1, 1]} : vector<8x128xf32> to vector<8x32xf32>
    %173 = arith.negf %172 : vector<8x32xf32>
    %174 = math.exp %173 : vector<8x32xf32>
    %cst_32 = arith.constant 1.000000e+00 : f32
    %175 = vector.broadcast %cst_32 : f32 to vector<8x32xf32>
    %176 = arith.addf %175, %174 : vector<8x32xf32>
    %177 = arith.divf %175, %176 : vector<8x32xf32>
    %178 = arith.mulf %169, %151 : vector<8x32xf32>
    %179 = arith.mulf %163, %171 : vector<8x32xf32>
    %180 = arith.addf %178, %179 : vector<8x32xf32>
    %181 = math.tanh %180 : vector<8x32xf32>
    %182 = arith.mulf %177, %181 : vector<8x32xf32>
    %183 = vector.extract_strided_slice %5 {offsets = [48, 0], sizes = [8, 128], strides = [1, 1]} : vector<64x128xf32> to vector<8x128xf32>
    %184 = arith.truncf %182 : vector<8x32xf32> to vector<8x32xbf16>
    %cst_33 = arith.constant dense<0.000000e+00> : vector<8x128xf32>
    %185 = tpu.matmul %184, %6, %cst_33 {dimension_numbers = #tpu.dot_dimension_numbers<[1], [0], [0], [1], [0, 0, 1, 1], [], []>} : vector<8x32xbf16>, vector<32x128xbf16>, vector<8x128xf32> -> vector<8x128xf32>
    %186 = arith.addf %183, %185 : vector<8x128xf32>
    %187 = vector.extract_strided_slice %186 {offsets = [0, 0], sizes = [8, 32], strides = [1, 1]} : vector<8x128xf32> to vector<8x32xf32>
    %188 = arith.negf %187 : vector<8x32xf32>
    %189 = math.exp %188 : vector<8x32xf32>
    %cst_34 = arith.constant 1.000000e+00 : f32
    %190 = vector.broadcast %cst_34 : f32 to vector<8x32xf32>
    %191 = arith.addf %190, %189 : vector<8x32xf32>
    %192 = arith.divf %190, %191 : vector<8x32xf32>
    %193 = vector.extract_strided_slice %186 {offsets = [0, 32], sizes = [8, 32], strides = [1, 1]} : vector<8x128xf32> to vector<8x32xf32>
    %194 = arith.negf %193 : vector<8x32xf32>
    %195 = math.exp %194 : vector<8x32xf32>
    %cst_35 = arith.constant 1.000000e+00 : f32
    %196 = vector.broadcast %cst_35 : f32 to vector<8x32xf32>
    %197 = arith.addf %196, %195 : vector<8x32xf32>
    %198 = arith.divf %196, %197 : vector<8x32xf32>
    %199 = vector.extract_strided_slice %186 {offsets = [0, 64], sizes = [8, 32], strides = [1, 1]} : vector<8x128xf32> to vector<8x32xf32>
    %200 = math.tanh %199 : vector<8x32xf32>
    %201 = vector.extract_strided_slice %186 {offsets = [0, 96], sizes = [8, 32], strides = [1, 1]} : vector<8x128xf32> to vector<8x32xf32>
    %202 = arith.negf %201 : vector<8x32xf32>
    %203 = math.exp %202 : vector<8x32xf32>
    %cst_36 = arith.constant 1.000000e+00 : f32
    %204 = vector.broadcast %cst_36 : f32 to vector<8x32xf32>
    %205 = arith.addf %204, %203 : vector<8x32xf32>
    %206 = arith.divf %204, %205 : vector<8x32xf32>
    %207 = arith.mulf %198, %180 : vector<8x32xf32>
    %208 = arith.mulf %192, %200 : vector<8x32xf32>
    %209 = arith.addf %207, %208 : vector<8x32xf32>
    %210 = math.tanh %209 : vector<8x32xf32>
    %211 = arith.mulf %206, %210 : vector<8x32xf32>
    %212 = vector.extract_strided_slice %5 {offsets = [56, 0], sizes = [8, 128], strides = [1, 1]} : vector<64x128xf32> to vector<8x128xf32>
    %213 = arith.truncf %211 : vector<8x32xf32> to vector<8x32xbf16>
    %cst_37 = arith.constant dense<0.000000e+00> : vector<8x128xf32>
    %214 = tpu.matmul %213, %6, %cst_37 {dimension_numbers = #tpu.dot_dimension_numbers<[1], [0], [0], [1], [0, 0, 1, 1], [], []>} : vector<8x32xbf16>, vector<32x128xbf16>, vector<8x128xf32> -> vector<8x128xf32>
    %215 = arith.addf %212, %214 : vector<8x128xf32>
    %216 = vector.extract_strided_slice %215 {offsets = [0, 0], sizes = [8, 32], strides = [1, 1]} : vector<8x128xf32> to vector<8x32xf32>
    %217 = arith.negf %216 : vector<8x32xf32>
    %218 = math.exp %217 : vector<8x32xf32>
    %cst_38 = arith.constant 1.000000e+00 : f32
    %219 = vector.broadcast %cst_38 : f32 to vector<8x32xf32>
    %220 = arith.addf %219, %218 : vector<8x32xf32>
    %221 = arith.divf %219, %220 : vector<8x32xf32>
    %222 = vector.extract_strided_slice %215 {offsets = [0, 32], sizes = [8, 32], strides = [1, 1]} : vector<8x128xf32> to vector<8x32xf32>
    %223 = arith.negf %222 : vector<8x32xf32>
    %224 = math.exp %223 : vector<8x32xf32>
    %cst_39 = arith.constant 1.000000e+00 : f32
    %225 = vector.broadcast %cst_39 : f32 to vector<8x32xf32>
    %226 = arith.addf %225, %224 : vector<8x32xf32>
    %227 = arith.divf %225, %226 : vector<8x32xf32>
    %228 = vector.extract_strided_slice %215 {offsets = [0, 64], sizes = [8, 32], strides = [1, 1]} : vector<8x128xf32> to vector<8x32xf32>
    %229 = math.tanh %228 : vector<8x32xf32>
    %230 = vector.extract_strided_slice %215 {offsets = [0, 96], sizes = [8, 32], strides = [1, 1]} : vector<8x128xf32> to vector<8x32xf32>
    %231 = arith.negf %230 : vector<8x32xf32>
    %232 = math.exp %231 : vector<8x32xf32>
    %cst_40 = arith.constant 1.000000e+00 : f32
    %233 = vector.broadcast %cst_40 : f32 to vector<8x32xf32>
    %234 = arith.addf %233, %232 : vector<8x32xf32>
    %235 = arith.divf %233, %234 : vector<8x32xf32>
    %236 = arith.mulf %227, %209 : vector<8x32xf32>
    %237 = arith.mulf %221, %229 : vector<8x32xf32>
    %238 = arith.addf %236, %237 : vector<8x32xf32>
    %239 = math.tanh %238 : vector<8x32xf32>
    %240 = arith.mulf %235, %239 : vector<8x32xf32>
    %241 = arith.truncf %240 : vector<8x32xf32> to vector<8x32xbf16>
    %c0_41 = arith.constant 0 : index
    %c0_42 = arith.constant 0 : index
    %242 = vector.load %arg4[%c0_41, %c0_42] : memref<32x128xbf16, #tpu.memory_space<vmem>>, vector<32x128xbf16>
    %cst_43 = arith.constant dense<0.000000e+00> : vector<8x128xf32>
    %243 = tpu.matmul %241, %242, %cst_43 {dimension_numbers = #tpu.dot_dimension_numbers<[1], [0], [0], [1], [0, 0, 1, 1], [], []>} : vector<8x32xbf16>, vector<32x128xbf16>, vector<8x128xf32> -> vector<8x128xf32>
    %c0_44 = arith.constant 0 : index
    %c0_45 = arith.constant 0 : index
    %244 = vector.load %arg5[%c0_44, %c0_45] : memref<1x128xf32, #tpu.memory_space<vmem>>, vector<1x128xf32>
    %245 = vector.broadcast %244 : vector<1x128xf32> to vector<8x128xf32>
    %246 = arith.addf %243, %245 : vector<8x128xf32>
    %c0_46 = arith.constant 0 : index
    %c0_47 = arith.constant 0 : index
    %247 = vector.load %arg6[%c0_46, %c0_47] : memref<8x128xf32, #tpu.memory_space<vmem>>, vector<8x128xf32>
    tpu.vector_store %arg6[%c0_46, %c0_47], %246 {strides = array<i32>} : memref<8x128xf32, #tpu.memory_space<vmem>>, vector<8x128xf32>,
    return
  }
}

</mosaic_0001>

<bundles_post_ra>
// kernel: tpu_custom_call.1
= control target key start
LH: loop header
LB: loop body
LE: loop exit
PB: predicated region body
PF: predicated region fallthrough
CT: control target
= control target key end

     0   :  { %v1068_v1 = vmov 0.0   ;;  %vm68_vm0 = vcmask 130048   ;;  %vm1069_vm1 = vmmov 0   ;;  %s1282_s0 = inlined_call_operand.vmem [shape: bf16[64,16], index: 0, kind: input, shape index: {}]   ;;  %s1283_s1 = inlined_call_operand.vmem [shape: bf16[16,128], index: 1, kind: input, shape index: {}]   ;;  %s1284_s2 = inlined_call_operand.vmem [shape: bf16[32,128], index: 2, kind: input, shape index: {}]   ;;  %s1285_s3 = inlined_call_operand.vmem [shape: f32[1,128], index: 3, kind: input, shape index: {}]   ;;  %s1286_s4 = inlined_call_operand.vmem [shape: bf16[32,128], index: 4, kind: input, shape index: {}]   ;;  %s1287_s5 = inlined_call_operand.vmem [shape: f32[1,128], index: 5, kind: input, shape index: {}]   ;;  %s1288_s6 = inlined_call_operand.hbm [shape: f32[8,128], index: 6, kind: output, shape index: {}]  }
   0x1   :  { %v971_v0 = vld [vmem:[%s1283_s1] sm:$0xff]   ;;  %893 = vmatprep.subr.bf16.mxu1 %v1068_v1  ;;  %v974_v4 = vld [vmem:[%s1282_s0 + $0x8] sm:$0xff]   ;;  %897 = vmatprep.mubr.msk.bf16.mxu1 %vm1069_vm1, %v1068_v1 }
   0x2   :  { %v1116_v2 = vld [vmem:[%s1284_s2] sm:$0xff]   ;;  %883 = vmatprep.subr.bf16.mxu0 %v971_v0  ;;  %v1130_v5 = vld [vmem:[%s1284_s2 + $0x8] sm:$0xff]  }
   0x3   :  { %v973_v3 = vld [vmem:[%s1282_s0] sm:$0xff]   ;;  %894 = vmatpush3.bf16.msra.mxu1 %v1116_v2  ;;  %884 = vmatpush3.bf16.msra.mxu0 %v971_v0 }
   0x4   :  { %885 = vmatprep.mubr.msk.bf16.mxu0 %vm68_vm0, %v973_v3  ;;  %895 = vmatprep.subr.bf16.mxu1 %v1068_v1 }
   0x5   :  { %909 = vmatprep.subr.bf16.mxu0 %v1068_v1 }
   0x6   :  { %886 = vmatmul.mubr.msk.bf16.vlgmr.msra.gmra.mrb[0].mxu0 %vm68_vm0, %v974_v4 }
   0x7   :  { %896 = vmatpush3.bf16.msra.mxu1 %v1130_v5  ;;  %910 = vmatpush3.bf16.msra.mxu0 %v1116_v2 }
   0x8   :  { %11 = vsyncpa [#allocation3], 0  ;;  %901 = vmatprep.subr.bf16.mxu1 %v1068_v1  ;;  %911 = vmatprep.subr.bf16.mxu0 %v1068_v1  ;;  %v1070_v6 = vmov 0   ;;  %v1151_v7 = vld [vmem:[%s1285_s3] ss:$0 sm:$0xff]  ;;  %s1071_s7 = smov 64  }
   0x9   :  { %s1072_s3 = smov 32   ;;  %vm162_vm2 = vcmask 261120   ;;  %v976_v49 = vld [vmem:[%s1282_s0 + $0x10] sm:$0xff]   ;;  %v977_v50 = vld [vmem:[%s1282_s0 + $0x18] sm:$0xff]   ;;  %s1073_s17 = smov [#allocation2]  }
   0xa   :  { %898 = vmatmul.mubr.bf16.vlgmr.msra.gmra.mrb[0].mxu1 %v1070_v6  ;;  %889 = vmatprep.mubr.msk.bf16.mxu0 %vm68_vm0, %v976_v49 }
   0xb   :  { %902 = vmatpush3.bf16.msra.mxu1 %v1116_v2  ;;  %905 = vmatprep.mubr.msk.bf16.mxu1 %vm1069_vm1, %v1068_v1 }
   0xc   :  { %903 = vmatprep.subr.bf16.mxu1 %v1068_v1  ;;  %912 = vmatpush3.bf16.msra.mxu0 %v1130_v5 }
   0xd   :  { %925 = vmatprep.subr.bf16.mxu0 %v1068_v1 }
   0xe   :  { %890 = vmatmul.mubr.msk.bf16.gmra.mrb[4].mxu0 %vm68_vm0, %v977_v50 }
   0xf   :  { %904 = vmatpush3.bf16.msra.mxu1 %v1130_v5  ;;  %913 = vmatprep.mubr.msk.bf16.mxu0 %vm1069_vm1, %v1068_v1 }
  0x10   :  { %917 = vmatprep.subr.bf16.mxu1 %v1068_v1 }
  0xd9   :  { %v1153_v8 = vpop.f32.mrb[0].mxu0 }
  0xda   :  { %v115_v9 = vpop.f32.mrb[1].mxu0  ;;  %v124_v60 = vadd.f32 %v1153_v8, %v1151_v7 }
  0xdb   :  { %v116_v10 = vadd.f32 %v1151_v7, %v115_v9  ;;  %v1156_v11 = vpop.f32.mrb[2].mxu0 }
  0xdc   :  { %v118_v12 = vpop.f32.mrb[3].mxu0 }
  0xdd   :  { %v200_v13 = vpop.f32.mrb[0].mxu1  ;;  %v119_v33 = vadd.f32 %v1151_v7, %v118_v12 }
  0xde   :  { %v206_v14 = vadd.f32 %v200_v13, %v116_v10  ;;  %v899_v15 = vpop.f32.mrb[1].mxu1 }
  0xdf   :  { %v203_v16 = vpop.f32.mrb[2].mxu1 }
  0xe0   :  { %980 = vtanh.f32 %v206_v14  ;;  %v900_v17 = vpop.f32.mrb[3].mxu1  ;;  %v832_v19 = vmul.f32 -1.442695, %v206_v14 }
  0xe1   :  { %v1184_v55 = vpop.f32.mrb[4].mxu0 }
  0xe2   :  { %982 = vpow2.f32 %v832_v19  ;;  %v1186_v56 = vpop.f32.mrb[5].mxu0 }
  0xe3   :  { %v1188_v57 = vpop.f32.mrb[6].mxu0 }
  0xe4   :  { %v1190_v58 = vpop.f32.mrb[7].mxu0 }
  0xea   :  { %v981_v18 = vpop.eup %980 }
  0xeb   :  { %216 = vrot.lane.b32.xlu0 %v981_v18, %s1071_s7 }
  0xec   :  { %v983_v20 = vpop.eup %982 }
  0xed   :  { %v210_v21 = vadd.f32 1.0, %v983_v20 }
  0xef   :  { %984 = vrcp.f32 %v210_v21 }
  0xf9   :  { %v985_v22 = vpop.eup %984 }
  0xfa   :  { %v214_v25 = vmul.f32 0.0, %v985_v22 }
 0x15d   :  { %v217_v23 = vpop.permute.xlu0 %216 }
 0x15e   :  { %v219_v24 = vmul.f32 %v985_v22, %v217_v23 }
 0x160   :  { %221 = vrot.lane.b32.xlu0 %v219_v24, %s1072_s3 }
 0x1d2   :  { %v222_v26 = vpop.permute.xlu0 %221 }
 0x1d3   :  { %v224_v27 = vadd.f32 %v222_v26, %v214_v25 }
 0x1d5   :  { %986 = vtanh.f32 %v224_v27 }
 0x1df   :  { %v987_v28 = vpop.eup %986 }
 0x1e0   :  { %227 = vrot.lane.b32.xlu1 %v987_v28, %s1071_s7 }
 0x252   :  { %v228_v29 = vpop.permute.xlu1 %227 }
 0x253   :  { %v230_v30 = vmul.f32 %v985_v22, %v228_v29  ;;  %v127_v22 = vadd.f32 %v1156_v11, %v1151_v7 }
 0x255   :  { %v231_v31 = vpack.c.bf16 %v230_v30, %v230_v30 }
 0x257   :  { %233 = vrot.lane.b32.xlu1 %v231_v31, %s1072_s3 }
 0x2c9   :  { %v234_v32 = vpop.permute.xlu1 %233 }
 0x2ca   :  { %906 = vmatmul.mubr.msk.bf16.vlgmr.msra.gmra.mrb[4].mxu1 %vm162_vm2, %v234_v32 }
 0x2cb   :  { %918 = vmatpush3.bf16.msra.mxu1 %v1116_v2  ;;  %921 = vmatprep.mubr.msk.bf16.mxu1 %vm1069_vm1, %v1068_v1 }
 0x2cc   :  { %919 = vmatprep.subr.bf16.mxu1 %v1068_v1 }
 0x2cf   :  { %920 = vmatpush3.bf16.msra.mxu1 %v1130_v5 }
 0x2d0   :  { %933 = vmatprep.subr.bf16.mxu1 %v1068_v1 }
 0x39d   :  { %v272_v34 = vpop.f32.mrb[4].mxu1 }
 0x39e   :  { %v278_v35 = vadd.f32 %v272_v34, %v119_v33  ;;  %v907_v36 = vpop.f32.mrb[5].mxu1 }
 0x39f   :  { %v275_v37 = vpop.f32.mrb[6].mxu1 }
 0x3a0   :  { %988 = vtanh.f32 %v278_v35  ;;  %v908_v38 = vpop.f32.mrb[7].mxu1  ;;  %v834_v40 = vmul.f32 -1.442695, %v278_v35 }
 0x3a2   :  { %990 = vpow2.f32 %v834_v40 }
 0x3aa   :  { %v989_v39 = vpop.eup %988 }
 0x3ab   :  { %288 = vrot.lane.b32.xlu0 %v989_v39, %s1071_s7 }
 0x3ac   :  { %v991_v41 = vpop.eup %990 }
 0x3ad   :  { %v282_v42 = vadd.f32 1.0, %v991_v41 }
 0x3af   :  { %992 = vrcp.f32 %v282_v42  ;;  %v132_v42 = vadd.f32 %v1151_v7, %v1186_v56 }
 0x3b9   :  { %v993_v43 = vpop.eup %992 }
 0x3ba   :  { %v286_v46 = vmul.f32 %v993_v43, %v224_v27 }
 0x41d   :  { %v289_v44 = vpop.permute.xlu0 %288 }
 0x41e   :  { %v291_v45 = vmul.f32 %v993_v43, %v289_v44 }
 0x420   :  { %293 = vrot.lane.b32.xlu1 %v291_v45, %s1072_s3 }
 0x492   :  { %v294_v47 = vpop.permute.xlu1 %293 }
 0x493   :  { %v296_v48 = vadd.f32 %v294_v47, %v286_v46 }
 0x495   :  { %994 = vtanh.f32 %v296_v48 }
 0x49f   :  { %v995_v51 = vpop.eup %994 }
 0x4a0   :  { %299 = vrot.lane.b32.xlu0 %v995_v51, %s1071_s7 }
 0x512   :  { %v300_v52 = vpop.permute.xlu0 %299 }
 0x513   :  { %v302_v53 = vmul.f32 %v993_v43, %v300_v52 }
 0x515   :  { %v303_v54 = vpack.c.bf16 %v302_v53, %v302_v53 }
 0x517   :  { %305 = vrot.lane.b32.xlu1 %v303_v54, %s1072_s3 }
 0x589   :  { %v306_v59 = vpop.permute.xlu1 %305 }
 0x58a   :  { %914 = vmatmul.mubr.msk.bf16.vlgmr.msra.gmra.mrb[8].mxu0 %vm162_vm2, %v306_v59 }
 0x58b   :  { %926 = vmatpush3.bf16.msra.mxu0 %v1116_v2  ;;  %929 = vmatprep.mubr.msk.bf16.mxu0 %vm1069_vm1, %v1068_v1 }
 0x58c   :  { %927 = vmatprep.subr.bf16.mxu0 %v1068_v1 }
 0x58f   :  { %928 = vmatpush3.bf16.msra.mxu0 %v1130_v5 }
 0x590   :  { %941 = vmatprep.subr.bf16.mxu0 %v1068_v1 }
 0x65d   :  { %v344_v61 = vpop.f32.mrb[8].mxu0 }
 0x65e   :  { %v350_v62 = vadd.f32 %v344_v61, %v124_v60  ;;  %v915_v63 = vpop.f32.mrb[9].mxu0 }
 0x65f   :  { %v347_v0 = vpop.f32.mrb[10].mxu0 }
 0x660   :  { %996 = vtanh.f32 %v350_v62  ;;  %v916_v3 = vpop.f32.mrb[11].mxu0  ;;  %v836_v6 = vmul.f32 -1.442695, %v350_v62 }
 0x662   :  { %998 = vpow2.f32 %v836_v6 }
 0x66a   :  { %v997_v4 = vpop.eup %996 }
 0x66b   :  { %360 = vrot.lane.b32.xlu0 %v997_v4, %s1071_s7  ;;  %v135_v4 = vadd.f32 %v1151_v7, %v1190_v58 }
 0x66c   :  { %v999_v9 = vpop.eup %998 }
 0x66d   :  { %v354_v10 = vadd.f32 1.0, %v999_v9 }
 0x66f   :  { %1000 = vrcp.f32 %v354_v10 }
 0x679   :  { %v1001_v12 = vpop.eup %1000 }
 0x67a   :  { %v358_v8 = vmul.f32 %v1001_v12, %v296_v48 }
 0x6dd   :  { %v361_v13 = vpop.permute.xlu0 %360 }
 0x6de   :  { %v363_v14 = vmul.f32 %v1001_v12, %v361_v13 }
 0x6e0   :  { %365 = vrot.lane.b32.xlu1 %v363_v14, %s1072_s3 }
 0x752   :  { %v366_v15 = vpop.permute.xlu1 %365 }
 0x753   :  { %v368_v16 = vadd.f32 %v366_v15, %v358_v8 }
 0x755   :  { %1002 = vtanh.f32 %v368_v16 }
 0x75f   :  { %v1003_v17 = vpop.eup %1002 }
 0x760   :  { %371 = vrot.lane.b32.xlu0 %v1003_v17, %s1071_s7 }
 0x7d2   :  { %v372_v18 = vpop.permute.xlu0 %371 }
 0x7d3   :  { %v374_v19 = vmul.f32 %v1001_v12, %v372_v18 }
 0x7d5   :  { %v375_v20 = vpack.c.bf16 %v374_v19, %v374_v19 }
 0x7d7   :  { %377 = vrot.lane.b32.xlu1 %v375_v20, %s1072_s3 }
 0x849   :  { %v378_v21 = vpop.permute.xlu1 %377 }
 0x84a   :  { %922 = vmatmul.mubr.msk.bf16.vlgmr.msra.gmra.mrb[8].mxu1 %vm162_vm2, %v378_v21 }
 0x84b   :  { %934 = vmatpush3.bf16.msra.mxu1 %v1116_v2  ;;  %937 = vmatprep.mubr.msk.bf16.mxu1 %vm1069_vm1, %v1068_v1 }
 0x84c   :  { %935 = vmatprep.subr.bf16.mxu1 %v1068_v1 }
 0x84f   :  { %936 = vmatpush3.bf16.msra.mxu1 %v1130_v5 }
 0x850   :  { %949 = vmatprep.subr.bf16.mxu1 %v1068_v1 }
 0x91d   :  { %v416_v23 = vpop.f32.mrb[8].mxu1 }
 0x91e   :  { %v422_v24 = vadd.f32 %v416_v23, %v127_v22  ;;  %v923_v25 = vpop.f32.mrb[9].mxu1 }
 0x91f   :  { %v419_v26 = vpop.f32.mrb[10].mxu1  ;;  %v140_v25 = vadd.f32 %v1184_v55, %v1151_v7 }
 0x920   :  { %1004 = vtanh.f32 %v422_v24  ;;  %v924_v27 = vpop.f32.mrb[11].mxu1  ;;  %v838_v29 = vmul.f32 -1.442695, %v422_v24 }
 0x922   :  { %1006 = vpow2.f32 %v838_v29 }
 0x92a   :  { %v1005_v28 = vpop.eup %1004 }
 0x92b   :  { %432 = vrot.lane.b32.xlu0 %v1005_v28, %s1071_s7 }
 0x92c   :  { %v1007_v30 = vpop.eup %1006 }
 0x92d   :  { %v426_v31 = vadd.f32 1.0, %v1007_v30 }
 0x92f   :  { %1008 = vrcp.f32 %v426_v31 }
 0x939   :  { %v1009_v32 = vpop.eup %1008 }
 0x93a   :  { %v430_v11 = vmul.f32 %v1009_v32, %v368_v16 }
 0x99d   :  { %v433_v33 = vpop.permute.xlu0 %432 }
 0x99e   :  { %v435_v34 = vmul.f32 %v1009_v32, %v433_v33 }
 0x9a0   :  { %437 = vrot.lane.b32.xlu1 %v435_v34, %s1072_s3 }
 0xa12   :  { %v438_v35 = vpop.permute.xlu1 %437 }
 0xa13   :  { %v440_v36 = vadd.f32 %v438_v35, %v430_v11 }
 0xa15   :  { %1010 = vtanh.f32 %v440_v36 }
 0xa1f   :  { %v1011_v37 = vpop.eup %1010 }
 0xa20   :  { %443 = vrot.lane.b32.xlu0 %v1011_v37, %s1071_s7 }
 0xa92   :  { %v444_v38 = vpop.permute.xlu0 %443 }
 0xa93   :  { %v446_v39 = vmul.f32 %v1009_v32, %v444_v38 }
 0xa95   :  { %v447_v40 = vpack.c.bf16 %v446_v39, %v446_v39 }
 0xa97   :  { %449 = vrot.lane.b32.xlu1 %v447_v40, %s1072_s3 }
 0xb09   :  { %v450_v41 = vpop.permute.xlu1 %449 }
 0xb0a   :  { %930 = vmatmul.mubr.msk.bf16.vlgmr.msra.gmra.mrb[12].mxu0 %vm162_vm2, %v450_v41 }
 0xb0b   :  { %942 = vmatpush3.bf16.msra.mxu0 %v1116_v2  ;;  %945 = vmatprep.mubr.msk.bf16.mxu0 %vm1069_vm1, %v1068_v1 }
 0xb0c   :  { %943 = vmatprep.subr.bf16.mxu0 %v1068_v1 }
 0xb0f   :  { %944 = vmatpush3.bf16.msra.mxu0 %v1130_v5 }
 0xb10   :  { %957 = vmatprep.subr.bf16.mxu0 %v1068_v1 }
 0xbdd   :  { %v488_v43 = vpop.f32.mrb[12].mxu0 }
 0xbde   :  { %v494_v44 = vadd.f32 %v488_v43, %v132_v42  ;;  %v931_v45 = vpop.f32.mrb[13].mxu0 }
 0xbdf   :  { %v491_v46 = vpop.f32.mrb[14].mxu0 }
 0xbe0   :  { %1012 = vtanh.f32 %v494_v44  ;;  %v932_v47 = vpop.f32.mrb[15].mxu0  ;;  %v840_v49 = vmul.f32 -1.442695, %v494_v44  ;;  %v143_v44 = vadd.f32 %v1188_v57, %v1151_v7 }
 0xbe2   :  { %1014 = vpow2.f32 %v840_v49 }
 0xbea   :  { %v1013_v48 = vpop.eup %1012 }
 0xbeb   :  { %504 = vrot.lane.b32.xlu0 %v1013_v48, %s1071_s7 }
 0xbec   :  { %v1015_v50 = vpop.eup %1014 }
 0xbed   :  { %v498_v51 = vadd.f32 1.0, %v1015_v50 }
 0xbef   :  { %1016 = vrcp.f32 %v498_v51 }
 0xbf9   :  { %v1017_v52 = vpop.eup %1016 }
 0xbfa   :  { %v502_v56 = vmul.f32 %v1017_v52, %v440_v36 }
 0xc5d   :  { %v505_v53 = vpop.permute.xlu0 %504 }
 0xc5e   :  { %v507_v54 = vmul.f32 %v1017_v52, %v505_v53 }
 0xc60   :  { %509 = vrot.lane.b32.xlu1 %v507_v54, %s1072_s3 }
 0xcd2   :  { %v510_v59 = vpop.permute.xlu1 %509 }
 0xcd3   :  { %v512_v60 = vadd.f32 %v510_v59, %v502_v56 }
 0xcd5   :  { %1018 = vtanh.f32 %v512_v60 }
 0xcdf   :  { %v1019_v61 = vpop.eup %1018 }
 0xce0   :  { %515 = vrot.lane.b32.xlu0 %v1019_v61, %s1071_s7  ;;  %v978_v61 = vld [vmem:[%s1286_s4] sm:$0xff]  }
 0xd52   :  { %v516_v62 = vpop.permute.xlu0 %515 }
 0xd53   :  { %v518_v63 = vmul.f32 %v1017_v52, %v516_v62  ;;  %v979_v62 = vld [vmem:[%s1286_s4 + $0x8] sm:$0xff]   ;;  %s812_s4 = sshll.u32 %s1073_s17, 4  ;;  %s813_s4 = int_to_ptr.vmem [resolvable:$true] %s812_s4 }
 0xd54   :  { %s1044_s18 = scalar_lea.vmem %s813_s4, 128  ;;  %p1049_p1 = scmp.lt.s32.totalorder %s813_s4, %s813_s4 }
 0xd55   :  { %v519_v0 = vpack.c.bf16 %v518_v63, %v518_v63  ;;  %p1045_p0 = scmp.ne.s32.totalorder %s813_s4, %s1044_s18  ;;  %p1050_p2 = scmp.lt.s32.totalorder %s1044_s18, %s1044_s18 }
 0xd57   :  { %521 = vrot.lane.b32.xlu1 %v519_v0, %s1072_s3  ;;  %p1051_p3 = por %p1050_p2, %p1049_p1 }
 0xd59   :  { %p1052_p4 = pnand %p1051_p3, %p1045_p0 }
 0xdc9   :  { %v522_v3 = vpop.permute.xlu1 %521 }
 0xdca   :  { %938 = vmatmul.mubr.msk.bf16.vlgmr.msra.gmra.mrb[12].mxu1 %vm162_vm2, %v522_v3 }
 0xdcb   :  { %950 = vmatpush3.bf16.msra.mxu1 %v1116_v2  ;;  %953 = vmatprep.mubr.msk.bf16.mxu1 %vm1069_vm1, %v1068_v1 }
 0xdcc   :  { %951 = vmatprep.subr.bf16.mxu1 %v1068_v1 }
 0xdcf   :  { %952 = vmatpush3.bf16.msra.mxu1 %v1130_v5 }
 0xe9d   :  { %v560_v6 = vpop.f32.mrb[12].mxu1 }
 0xe9e   :  { %v566_v9 = vadd.f32 %v560_v6, %v135_v4  ;;  %v939_v10 = vpop.f32.mrb[13].mxu1 }
 0xe9f   :  { %v563_v12 = vpop.f32.mrb[14].mxu1 }
 0xea0   :  { %1020 = vtanh.f32 %v566_v9  ;;  %v940_v13 = vpop.f32.mrb[15].mxu1  ;;  %v842_v2 = vmul.f32 -1.442695, %v566_v9  ;;  %v847_v9 = vld [vmem:[%s1287_s5] ss:$0 sm:$0xff] }
 0xea2   :  { %1022 = vpow2.f32 %v842_v2 }
 0xeaa   :  { %v1021_v14 = vpop.eup %1020 }
 0xeab   :  { %576 = vrot.lane.b32.xlu0 %v1021_v14, %s1071_s7 }
 0xeac   :  { %v1023_v8 = vpop.eup %1022 }
 0xead   :  { %v570_v15 = vadd.f32 1.0, %v1023_v8 }
 0xeaf   :  { %1024 = vrcp.f32 %v570_v15 }
 0xeb9   :  { %v1025_v16 = vpop.eup %1024 }
 0xeba   :  { %v574_v58 = vmul.f32 %v1025_v16, %v512_v60 }
 0xf1d   :  { %v577_v17 = vpop.permute.xlu0 %576 }
 0xf1e   :  { %v579_v5 = vmul.f32 %v1025_v16, %v577_v17 }
 0xf20   :  { %581 = vrot.lane.b32.xlu1 %v579_v5, %s1072_s3 }
 0xf92   :  { %v582_v18 = vpop.permute.xlu1 %581 }
 0xf93   :  { %v584_v19 = vadd.f32 %v582_v18, %v574_v58 }
 0xf95   :  { %1026 = vtanh.f32 %v584_v19 }
 0xf9f   :  { %v1027_v20 = vpop.eup %1026 }
 0xfa0   :  { %587 = vrot.lane.b32.xlu0 %v1027_v20, %s1071_s7 }
0x1012   :  { %v588_v21 = vpop.permute.xlu0 %587 }
0x1013   :  { %v590_v22 = vmul.f32 %v1025_v16, %v588_v21 }
0x1015   :  { %v591_v23 = vpack.c.bf16 %v590_v22, %v590_v22 }
0x1017   :  { %593 = vrot.lane.b32.xlu1 %v591_v23, %s1072_s3 }
0x1089   :  { %v594_v24 = vpop.permute.xlu1 %593 }
0x108a   :  { %946 = vmatmul.mubr.msk.bf16.vlgmr.msra.gmra.mrb[16].mxu0 %vm162_vm2, %v594_v24 }
0x108b   :  { %961 = vmatprep.mubr.msk.bf16.mxu0 %vm1069_vm1, %v1068_v1  ;;  %958 = vmatpush3.bf16.msra.mxu0 %v978_v61 }
0x108c   :  { %959 = vmatprep.subr.bf16.mxu0 %v1068_v1 }
0x108f   :  { %960 = vmatpush3.bf16.msra.mxu0 %v979_v62 }
0x115d   :  { %v632_v26 = vpop.f32.mrb[16].mxu0 }
0x115e   :  { %v638_v27 = vadd.f32 %v632_v26, %v140_v25  ;;  %v947_v28 = vpop.f32.mrb[17].mxu0 }
0x115f   :  { %v635_v29 = vpop.f32.mrb[18].mxu0 }
0x1160   :  { %1028 = vtanh.f32 %v638_v27  ;;  %v948_v30 = vpop.f32.mrb[19].mxu0  ;;  %v844_v32 = vmul.f32 -1.442695, %v638_v27 }
0x1162   :  { %1030 = vpow2.f32 %v844_v32 }
0x116a   :  { %v1029_v31 = vpop.eup %1028 }
0x116b   :  { %648 = vrot.lane.b32.xlu0 %v1029_v31, %s1071_s7 }
0x116c   :  { %v1031_v33 = vpop.eup %1030 }
0x116d   :  { %v642_v34 = vadd.f32 1.0, %v1031_v33 }
0x116f   :  { %1032 = vrcp.f32 %v642_v34 }
0x1179   :  { %v1033_v11 = vpop.eup %1032 }
0x117a   :  { %v646_v55 = vmul.f32 %v1033_v11, %v584_v19 }
0x11dd   :  { %v649_v35 = vpop.permute.xlu0 %648 }
0x11de   :  { %v651_v36 = vmul.f32 %v1033_v11, %v649_v35 }
0x11e0   :  { %653 = vrot.lane.b32.xlu1 %v651_v36, %s1072_s3 }
0x1252   :  { %v654_v37 = vpop.permute.xlu1 %653 }
0x1253   :  { %v656_v38 = vadd.f32 %v654_v37, %v646_v55 }
0x1255   :  { %1034 = vtanh.f32 %v656_v38 }
0x125f   :  { %v1035_v39 = vpop.eup %1034 }
0x1260   :  { %659 = vrot.lane.b32.xlu0 %v1035_v39, %s1071_s7 }
0x12d2   :  { %v660_v40 = vpop.permute.xlu0 %659 }
0x12d3   :  { %v662_v41 = vmul.f32 %v1033_v11, %v660_v40 }
0x12d5   :  { %v663_v42 = vpack.c.bf16 %v662_v41, %v662_v41 }
0x12d7   :  { %665 = vrot.lane.b32.xlu1 %v663_v42, %s1072_s3 }
0x1349   :  { %v666_v43 = vpop.permute.xlu1 %665 }
0x134a   :  { %954 = vmatmul.mubr.msk.bf16.vlgmr.msra.gmra.mrb[16].mxu1 %vm162_vm2, %v666_v43 }
0x141d   :  { %v704_v45 = vpop.f32.mrb[16].mxu1 }
0x141e   :  { %v710_v46 = vadd.f32 %v704_v45, %v143_v44  ;;  %v955_v47 = vpop.f32.mrb[17].mxu1 }
0x141f   :  { %v707_v48 = vpop.f32.mrb[18].mxu1 }
0x1420   :  { %1036 = vtanh.f32 %v710_v46  ;;  %v956_v49 = vpop.f32.mrb[19].mxu1  ;;  %v846_v51 = vmul.f32 -1.442695, %v710_v46 }
0x1422   :  { %1038 = vpow2.f32 %v846_v51 }
0x142a   :  { %v1037_v50 = vpop.eup %1036 }
0x142b   :  { %720 = vrot.lane.b32.xlu0 %v1037_v50, %s1071_s7 }
0x142c   :  { %v1039_v52 = vpop.eup %1038 }
0x142d   :  { %v714_v53 = vadd.f32 1.0, %v1039_v52 }
0x142f   :  { %1040 = vrcp.f32 %v714_v53 }
0x1439   :  { %v1041_v54 = vpop.eup %1040 }
0x143a   :  { %v718_v7 = vmul.f32 %v1041_v54, %v656_v38 }
0x149d   :  { %v721_v56 = vpop.permute.xlu0 %720 }
0x149e   :  { %v723_v59 = vmul.f32 %v1041_v54, %v721_v56 }
0x14a0   :  { %725 = vrot.lane.b32.xlu1 %v723_v59, %s1072_s3 }
0x1512   :  { %v726_v57 = vpop.permute.xlu1 %725 }
0x1513   :  { %v728_v60 = vadd.f32 %v726_v57, %v718_v7 }
0x1515   :  { %1042 = vtanh.f32 %v728_v60 }
0x151f   :  { %v1043_v63 = vpop.eup %1042 }
0x1520   :  { %731 = vrot.lane.b32.xlu0 %v1043_v63, %s1071_s7 }
0x1592   :  { %v732_v0 = vpop.permute.xlu0 %731 }
0x1593   :  { %v734_v3 = vmul.f32 %v1041_v54, %v732_v0 }
0x1595   :  { %v735_v4 = vpack.c.bf16 %v734_v3, %v734_v3 }
0x1597   :  { %748 = vrot.lane.b32.xlu1 %v735_v4, %s1072_s3 }
0x1609   :  { %v749_v6 = vpop.permute.xlu1 %748 }
0x160a   :  { %962 = vmatmul.mubr.msk.bf16.vlgmr.msra.gmra.mrb[20].mxu0 %vm162_vm2, %v749_v6 }
0x16dd   :  { %v799_v10 = vpop.f32.mrb[20].mxu0 }
0x16de   :  { %v800_v1 = vadd.f32 %v847_v9, %v799_v10  ;;  %v963_v12 = vpop.f32.mrb[21].mxu0 }
0x16df   :  { %v802_v13 = vpop.f32.mrb[22].mxu0 }
0x16e0   :  { %805 = vst [vmem:[#allocation2] sm:$0xff] %v800_v1  ;;  %v964_v14 = vpop.f32.mrb[23].mxu0 }
0x16e1   :  { %1055 = shalt.err (!%p1052_p4)
}
0x16e2   :  { %s1056_s5 = scalar_lea.hbm %s1288_s6, 128 }
0x16e3   :  { %p1057_p5 = scmp.ne.s32.totalorder %s1288_s6, %s1056_s5  ;;  %p1060_p6 = scmp.lt.u32.totalorder %s1056_s5, %s1288_s6 }
0x16e5   :  { %p1062_p7 = pnand %p1060_p6, %p1057_p5 }
0x16e7   :  { %1065 = shalt.err (!%p1062_p7)
}
0x16e8   :  { %815 = dma.vmem_to_hbm [thread:$0]  %s813_s4, 128, %s1288_s6, [#allocation3]  }
0x16e9   :  { %1066 = dma.done.wait [#allocation3], 128  }
0x16ea   :  { %1067 = vsyncadd [#allocation3], 4294967168 }
0x16eb   :  { %819 = vsyncpa [#allocation3], 1 }

</bundles_post_ra>
